<compile_context>
chip_gen: v5e
topology: v5e:2x2
jax: 0.10.0
libtpu: 0.0.40
codegen_flags: <defaults>
</compile_context>

<pallas_src>
import functools

import jax
import jax.numpy as jnp
from jax.experimental import pallas as pl
from jax.experimental.pallas import tpu as pltpu


def _round_up(x: int, m: int) -> int:
    return pl.cdiv(x, m) * m


def _default_min_steps() -> int:
    # v7x has 2 TensorCores per chip; make sure the "parallel" row-grid has >= 2
    # steps there so both cores get work.  v5e/v6e have a single TensorCore.
    try:
        kind = jax.devices()[0].device_kind.lower()
        if "v7" in kind or "tpu7" in kind:
            return 2
    except Exception:
        pass
    return 1


def _classifier_kernel(x_ref, w1t_ref, b1_ref, w2_ref, mask_ref, b2_ref, o_ref,
                       *, gelu_approx: bool):
    # x_ref:    (tm, H)  f32   sentence-vector tile, natural row-major layout
    # w1t_ref:  (H, Dp)  bf16  linear1 weight, pre-transposed, resident across grid
    # b1_ref:   (1, Dp)  f32   linear1 bias row, resident
    # w2_ref:   (1, Dp)  f32   linear2 weight row, resident
    # mask_ref: (tm, 1)  f32   mask column tile
    # b2_ref:   (1, 1)   f32   linear2 bias scalar in SMEM
    # o_ref:    (tm, 1)  f32   sent_scores column tile

    # Cast to bf16 in-kernel (hidden under the MXU), then linear1 with f32 accumulation.
    x_bf = x_ref[...].astype(jnp.bfloat16)
    h = jnp.dot(x_bf, w1t_ref[...], preferred_element_type=jnp.float32)   # (tm, Dp)
    h = h + b1_ref[...]          # row-bias broadcast along sublanes
    # (Minor further win: fold b1 into the matmul via a ones column if the VALU
    #  slot is still co-binding after the GELU change below.)

    if gelu_approx:
        # tanh-approx GELU: the transcendental goes to the EUP slot (v6e/v7x win).
        c = jnp.float32(0.7978845608028654)   # sqrt(2/pi)
        a = jnp.float32(0.044715)
        h = 0.5 * h * (1.0 + jnp.tanh(c * (h + a * h * h * h)))
    else:
        # exact GELU (torch.nn.GELU default): 0.5*x*(1+erf(x/sqrt(2))) — f32 VPU path.
        h = 0.5 * h * (1.0 + jax.lax.erf(h * jnp.float32(0.7071067811865476)))

    # dropout1: identity at inference time.
    # TODO(synk): training-mode dropout (p=0.1) not implemented; eval semantics used.

    # linear2 collapsed to a VPU multiply + lane reduce against the (1, Dp) w2 row;
    # avoids driving the MXU with a 1-wide output.  Scalar bias from SMEM.
    s = jnp.sum(h * w2_ref[...], axis=-1, keepdims=True) + b2_ref[0, 0]   # (tm, 1)

    # squeeze(-1) * mask, then sent_scores[sent_scores == 0] = -9000.0 (torch-faithful;
    # note this also clobbers any valid score that is exactly 0, mirroring the module).
    s = s * mask_ref[...]
    o_ref[...] = jnp.where(s == 0.0, jnp.float32(-9000.0), s)


def prepare_classifier_params(w1, b1, w2, b2):
    """One-time weight prep (do NOT repeat per forward call):
    transpose w1 to (H, Dp) bf16 (pad D to a multiple of 128), keep b1/w2 as f32
    (1, Dp) rows, and b2 as a (1, 1) scalar for SMEM."""
    D, H = w1.shape                       # torch nn.Linear: w1 (D, H), w2 (1, D)
    Dp = _round_up(D, 128)
    w1t = jnp.zeros((H, Dp), jnp.bfloat16).at[:, :D].set(w1.T.astype(jnp.bfloat16))
    b1_row = jnp.zeros((1, Dp), jnp.float32).at[0, :D].set(b1.astype(jnp.float32))
    w2_row = jnp.zeros((1, Dp), jnp.float32).at[0, :D].set(
        w2.reshape(D).astype(jnp.float32))
    b2_s = jnp.asarray(b2, jnp.float32).reshape(1, 1)
    return dict(w1t=w1t, b1=b1_row, w2=w2_row, b2=b2_s, hidden=H, linear_hidden=D)


def linear_classifier_forward(x, mask, params, *, block_rows=1024,
                              gelu_approx=True, min_steps=None):
    """x: (B, S, H), mask: (B, S) -> sent_scores: (B, S) float32.

    block_rows = max sentences per grid step (default 1024: <=~25 MiB live VMEM at
    H=768 / D=1536, fits v7x's 64 MiB with double-buffering and is comfortable on
    v5e/v6e).  The actual tile tm is shrunk to ceil(N/steps) rounded to 128 so the
    last-tile padding waste stays small; on v7x at least 2 steps are used so both
    TensorCores get work.
    """
    B, S, H = x.shape
    assert H == params["hidden"]
    Dp = params["w1t"].shape[1]
    N = B * S

    if min_steps is None:
        min_steps = _default_min_steps()

    tm_max = _round_up(max(int(block_rows), 128), 128)
    steps = max(pl.cdiv(N, tm_max), 1)
    if N >= 256:
        steps = max(steps, min_steps)              # keep both v7x TCs busy
    tm = _round_up(pl.cdiv(N, steps), 128)         # bounds pad waste to < steps*128 rows
    n_pad = steps * tm

    # Natural row-major layout; no transpose/relayout and no dtype pass in the
    # wrapper (the bf16 cast happens in-kernel).  Only a cheap row pad if needed.
    x2 = x.reshape(N, H)
    mask_col = mask.reshape(N, 1).astype(jnp.float32)
    if n_pad != N:
        pad = n_pad - N
        x2 = jnp.pad(x2, ((0, pad), (0, 0)))
        mask_col = jnp.pad(mask_col, ((0, pad), (0, 0)))

    kernel = functools.partial(_classifier_kernel, gelu_approx=gelu_approx)

    out = pl.pallas_call(
        kernel,
        out_shape=jax.ShapeDtypeStruct((n_pad, 1), jnp.float32),
        grid=(steps,),
        in_specs=[
            pl.BlockSpec((tm, H), lambda i: (i, 0)),        # x tile (pipelined, depth 2)
            pl.BlockSpec((H, Dp), lambda i: (0, 0)),        # w1^T (resident)
            pl.BlockSpec((1, Dp), lambda i: (0, 0)),        # b1 row (resident)
            pl.BlockSpec((1, Dp), lambda i: (0, 0)),        # w2 row (resident)
            pl.BlockSpec((tm, 1), lambda i: (i, 0)),        # mask column tile
            pl.BlockSpec((1, 1), lambda i: (0, 0),
                         memory_space=pltpu.MemorySpace.SMEM),   # b2 scalar
        ],
        out_specs=pl.BlockSpec((tm, 1), lambda i: (i, 0)),  # sent_scores column tile
        compiler_params=pltpu.CompilerParams(
            dimension_semantics=("parallel",),               # shard rows across TCs (v7x)
            vmem_limit_bytes=48 * 1024 * 1024,
        ),
    )(x2, params["w1t"], params["b1"], params["w2"], mask_col, params["b2"])

    return out[:N, 0].reshape(B, S)


if __name__ == "__main__":
    # Small shapes consistent with the module: batch=2, seq=8, hidden=32,
    # linear_hidden=64 (stand-ins for the real H=768, linear_hidden=1536).
    B, S, H, D = 2, 8, 32, 64

    key = jax.random.PRNGKey(0)
    kx, km, kw1, kb1, kw2, kb2 = jax.random.split(key, 6)

    x = jax.random.normal(kx, (B, S, H), dtype=jnp.float32)
    # binary mask with a few padded (zero) positions
    mask = (jax.random.uniform(km, (B, S)) > 0.25).astype(jnp.float32)

    # torch.nn.Linear-shaped params: w1 (D, H), b1 (D,), w2 (1, D), b2 (1,)
    bound1 = 1.0 / jnp.sqrt(jnp.float32(H))
    w1 = jax.random.uniform(kw1, (D, H), minval=-bound1, maxval=bound1, dtype=jnp.float32)
    b1 = jax.random.uniform(kb1, (D,), minval=-bound1, maxval=bound1, dtype=jnp.float32)
    bound2 = 1.0 / jnp.sqrt(jnp.float32(D))
    w2 = jax.random.uniform(kw2, (1, D), minval=-bound2, maxval=bound2, dtype=jnp.float32)
    b2 = jax.random.uniform(kb2, (1,), minval=-bound2, maxval=bound2, dtype=jnp.float32)

    params = prepare_classifier_params(w1, b1, w2, b2)      # one-time weight prep
    sent_scores = linear_classifier_forward(x, mask, params, block_rows=128)
    jax.block_until_ready(sent_scores)

    # pure-JAX f32 reference with exact (torch-default) GELU
    h_ref = x @ w1.T + b1
    h_ref = 0.5 * h_ref * (1.0 + jax.lax.erf(h_ref / jnp.sqrt(jnp.float32(2.0))))
    s_ref = (h_ref @ w2.T + b2).squeeze(-1) * mask
    s_ref = jnp.where(s_ref == 0.0, -9000.0, s_ref)

    assert sent_scores.shape == (B, S)
    # bf16 matmul operands + tanh-approx GELU -> relaxed tolerance vs the f32 reference
    assert jnp.allclose(sent_scores, s_ref, atol=3e-2, rtol=3e-2), (
        float(jnp.max(jnp.abs(sent_scores - s_ref))))

    print("KERNEL_OK")
</pallas_src>

<mosaic_0001>
module attributes {stable_mosaic.version = 11 : i64} {
  func.func @_classifier_kernel(%arg0: i32, %arg1: memref<128x32xf32, #tpu.memory_space<vmem>>, %arg2: memref<32x128xbf16, #tpu.memory_space<vmem>>, %arg3: memref<1x128xf32, #tpu.memory_space<vmem>>, %arg4: memref<1x128xf32, #tpu.memory_space<vmem>>, %arg5: memref<128x1xf32, #tpu.memory_space<vmem>>, %arg6: memref<1x1xf32, #tpu.memory_space<smem>>, %arg7: memref<128x1xf32, #tpu.memory_space<vmem>>) attributes {dimension_semantics = [#tpu.dimension_semantics<parallel>], iteration_bounds = array<i64: 1>, scalar_prefetch = 0 : i64, scratch_operands = 0 : i64, tpu.core_type = #tpu.core_type<tc>, window_params = [{transform_indices = @transform_0, window_bounds = array<i64: 128, 32>}, {pipeline_mode = #tpu.pipeline_mode<synchronous>, transform_indices = @transform_1, window_bounds = array<i64: 32, 128>}, {pipeline_mode = #tpu.pipeline_mode<synchronous>, transform_indices = @transform_2, window_bounds = array<i64: 1, 128>}, {pipeline_mode = #tpu.pipeline_mode<synchronous>, transform_indices = @transform_3, window_bounds = array<i64: 1, 128>}, {transform_indices = @transform_4, window_bounds = array<i64: 128, 1>}, {transform_indices = @transform_5, window_bounds = array<i64: 1, 1>}, {transform_indices = @transform_6, window_bounds = array<i64: 128, 1>}]} {
    %c0 = arith.constant 0 : index
    %c0_0 = arith.constant 0 : index
    %0 = vector.load %arg1[%c0, %c0_0] : memref<128x32xf32, #tpu.memory_space<vmem>>, vector<128x32xf32>
    %1 = arith.truncf %0 : vector<128x32xf32> to vector<128x32xbf16>
    %c0_1 = arith.constant 0 : index
    %c0_2 = arith.constant 0 : index
    %2 = vector.load %arg2[%c0_1, %c0_2] : memref<32x128xbf16, #tpu.memory_space<vmem>>, vector<32x128xbf16>
    %cst = arith.constant dense<0.000000e+00> : vector<128x128xf32>
    %3 = tpu.matmul %1, %2, %cst {dimension_numbers = #tpu.dot_dimension_numbers<[1], [0], [0], [1], [0, 0, 1, 1], [], []>} : vector<128x32xbf16>, vector<32x128xbf16>, vector<128x128xf32> -> vector<128x128xf32>
    %c0_3 = arith.constant 0 : index
    %c0_4 = arith.constant 0 : index
    %4 = vector.load %arg3[%c0_3, %c0_4] : memref<1x128xf32, #tpu.memory_space<vmem>>, vector<1x128xf32>
    %5 = vector.broadcast %4 : vector<1x128xf32> to vector<128x128xf32>
    %6 = arith.addf %3, %5 : vector<128x128xf32>
    %cst_5 = arith.constant 5.000000e-01 : f32
    %7 = vector.broadcast %cst_5 : f32 to vector<128x128xf32>
    %8 = arith.mulf %7, %6 : vector<128x128xf32>
    %cst_6 = arith.constant 4.471500e-02 : f32
    %9 = vector.broadcast %cst_6 : f32 to vector<128x128xf32>
    %10 = arith.mulf %9, %6 : vector<128x128xf32>
    %11 = arith.mulf %10, %6 : vector<128x128xf32>
    %12 = arith.mulf %11, %6 : vector<128x128xf32>
    %13 = arith.addf %6, %12 : vector<128x128xf32>
    %cst_7 = arith.constant 0.797884583 : f32
    %14 = vector.broadcast %cst_7 : f32 to vector<128x128xf32>
    %15 = arith.mulf %14, %13 : vector<128x128xf32>
    %16 = math.tanh %15 : vector<128x128xf32>
    %cst_8 = arith.constant 1.000000e+00 : f32
    %17 = vector.broadcast %cst_8 : f32 to vector<128x128xf32>
    %18 = arith.addf %17, %16 : vector<128x128xf32>
    %19 = arith.mulf %8, %18 : vector<128x128xf32>
    %c0_9 = arith.constant 0 : index
    %c0_10 = arith.constant 0 : index
    %20 = vector.load %arg4[%c0_9, %c0_10] : memref<1x128xf32, #tpu.memory_space<vmem>>, vector<1x128xf32>
    %21 = vector.broadcast %20 : vector<1x128xf32> to vector<128x128xf32>
    %22 = arith.mulf %19, %21 : vector<128x128xf32>
    %cst_11 = arith.constant dense<0.000000e+00> : vector<128xf32>
    %23 = vector.multi_reduction <add>, %22, %cst_11 [1] : vector<128x128xf32> to vector<128xf32>
    %24 = vector.shape_cast %23 : vector<128xf32> to vector<128x1xf32>
    %c0_12 = arith.constant 0 : index
    %c0_13 = arith.constant 0 : index
    %25 = memref.load %arg6[%c0_12, %c0_13] : memref<1x1xf32, #tpu.memory_space<smem>>
    %26 = vector.broadcast %25 : f32 to vector<128x1xf32>
    %27 = arith.addf %24, %26 : vector<128x1xf32>
    %c0_14 = arith.constant 0 : index
    %c0_15 = arith.constant 0 : index
    %28 = vector.load %arg5[%c0_14, %c0_15] : memref<128x1xf32, #tpu.memory_space<vmem>>, vector<128x1xf32>
    %29 = arith.mulf %27, %28 : vector<128x1xf32>
    %cst_16 = arith.constant 0.000000e+00 : f32
    %30 = vector.broadcast %cst_16 : f32 to vector<128x1xf32>
    %31 = arith.cmpf oeq, %29, %30 : vector<128x1xf32>
    %cst_17 = arith.constant -9.000000e+03 : f32
    %32 = vector.broadcast %cst_17 : f32 to vector<128x1xf32>
    %33 = arith.select %31, %32, %29 : vector<128x1xi1>, vector<128x1xf32>
    %c0_18 = arith.constant 0 : index
    %c0_19 = arith.constant 0 : index
    %34 = vector.load %arg7[%c0_18, %c0_19] : memref<128x1xf32, #tpu.memory_space<vmem>>, vector<128x1xf32>
    tpu.vector_store %arg7[%c0_18, %c0_19], %33 {strides = array<i32>} : memref<128x1xf32, #tpu.memory_space<vmem>>, vector<128x1xf32>,
    return
  }
  func.func @transform_0(%arg0: i32) -> (i32, i32) {
    %c0_i32 = arith.constant 0 : i32
    %c0_i32_0 = arith.constant 0 : i32
    return %arg0, %c0_i32 : i32, i32
  }
  func.func @transform_1(%arg0: i32) -> (i32, i32) {
    %c0_i32 = arith.constant 0 : i32
    %c0_i32_0 = arith.constant 0 : i32
    %c0_i32_1 = arith.constant 0 : i32
    return %c0_i32, %c0_i32_0 : i32, i32
  }
  func.func @transform_2(%arg0: i32) -> (i32, i32) {
    %c0_i32 = arith.constant 0 : i32
    %c0_i32_0 = arith.constant 0 : i32
    %c0_i32_1 = arith.constant 0 : i32
    return %c0_i32, %c0_i32_0 : i32, i32
  }
  func.func @transform_3(%arg0: i32) -> (i32, i32) {
    %c0_i32 = arith.constant 0 : i32
    %c0_i32_0 = arith.constant 0 : i32
    %c0_i32_1 = arith.constant 0 : i32
    return %c0_i32, %c0_i32_0 : i32, i32
  }
  func.func @transform_4(%arg0: i32) -> (i32, i32) {
    %c0_i32 = arith.constant 0 : i32
    %c0_i32_0 = arith.constant 0 : i32
    return %arg0, %c0_i32 : i32, i32
  }
  func.func @transform_5(%arg0: i32) -> (i32, i32) {
    %c0_i32 = arith.constant 0 : i32
    %c0_i32_0 = arith.constant 0 : i32
    %c0_i32_1 = arith.constant 0 : i32
    return %c0_i32, %c0_i32_0 : i32, i32
  }
  func.func @transform_6(%arg0: i32) -> (i32, i32) {
    %c0_i32 = arith.constant 0 : i32
    %c0_i32_0 = arith.constant 0 : i32
    return %arg0, %c0_i32 : i32, i32
  }
}

</mosaic_0001>

<bundles_post_ra>
// kernel: tpu_custom_call.1
= control target key start
LH: loop header
LB: loop body
LE: loop exit
PB: predicated region body
PF: predicated region fallthrough
CT: control target
= control target key end

     0   :  { %vm69_vm0 = vcmask 261120   ;;  %vm421_vm1 = vcmask 7168   ;;  %s859_s1 = inlined_call_operand.vmem [shape: bf16[32,128], index: 1, kind: input, shape index: {}]   ;;  %s860_s0 = inlined_call_operand.vmem [shape: f32[128,32], index: 0, kind: input, shape index: {}]   ;;  %s861_s2 = inlined_call_operand.vmem [shape: f32[1,128], index: 2, kind: input, shape index: {}]   ;;  %s862_s3 = inlined_call_operand.vmem [shape: f32[1,128], index: 3, kind: input, shape index: {}]   ;;  %s863_s5 = inlined_call_operand.<no memory space> [shape: f32[1,1], index: 5, kind: input, shape index: {}]   ;;  %s864_s4 = inlined_call_operand.vmem [shape: f32[128,1], index: 4, kind: input, shape index: {}]   ;;  %s865_s6 = inlined_call_operand.vmem [shape: f32[128,1], index: 6, kind: output, shape index: {}]  }
   0x1   :  { %v459_v0 = vld [vmem:[%s859_s1 + $0x8] sm:$0xff]  ;;  %v458_v1 = vld [vmem:[%s859_s1] sm:$0xff]  ;;  %v27_v14 = vld [vmem:[%s860_s0 + $0x10] sm:$0xff] }
   0x2   :  { %v25_v2 = vld [vmem:[%s860_s0] sm:$0xff]  ;;  %v26_v3 = vld [vmem:[%s860_s0 + $0x8] sm:$0xff]  ;;  %100 = vmatpush.bf16.msra.mxu0 %v459_v0  ;;  %460 = vmatpush.bf16.msra.mxu1 %v459_v0  ;;  %v28_v15 = vld [vmem:[%s860_s0 + $0x18] sm:$0xff] }
   0x3   :  { %v29_v4 = vld [vmem:[%s860_s0 + $0x20] sm:$0xff]  ;;  %v30_v5 = vld [vmem:[%s860_s0 + $0x28] sm:$0xff]  ;;  %461 = vmatpush.bf16.msra.mxu2 %v459_v0  ;;  %462 = vmatpush.bf16.msra.mxu3 %v459_v0  ;;  %v41_v10 = vpack.c.bf16 %v26_v3, %v25_v2  ;;  %v31_v16 = vld [vmem:[%s860_s0 + $0x30] sm:$0xff]  ;;  %v42_v22 = vpack.c.bf16 %v28_v15, %v27_v14 }
   0x4   :  { %v33_v6 = vld [vmem:[%s860_s0 + $0x40] sm:$0xff]  ;;  %v34_v7 = vld [vmem:[%s860_s0 + $0x48] sm:$0xff]  ;;  %v43_v11 = vpack.c.bf16 %v30_v5, %v29_v4  ;;  %v32_v17 = vld [vmem:[%s860_s0 + $0x38] sm:$0xff] }
   0x5   :  { %v37_v8 = vld [vmem:[%s860_s0 + $0x60] sm:$0xff]  ;;  %v38_v9 = vld [vmem:[%s860_s0 + $0x68] sm:$0xff]  ;;  %v45_v12 = vpack.c.bf16 %v34_v7, %v33_v6  ;;  %v35_v18 = vld [vmem:[%s860_s0 + $0x50] sm:$0xff]  ;;  %v44_v23 = vpack.c.bf16 %v32_v17, %v31_v16 }
   0x6   :  { %101 = vmatpush.bf16.msra.mxu0 %v458_v1  ;;  %463 = vmatpush.bf16.msra.mxu1 %v458_v1  ;;  %v47_v13 = vpack.c.bf16 %v38_v9, %v37_v8  ;;  %v36_v19 = vld [vmem:[%s860_s0 + $0x58] sm:$0xff]  ;;  %v39_v20 = vld [vmem:[%s860_s0 + $0x70] sm:$0xff]  ;;  %v600_v26 = vld [vmem:[%s861_s2] ss:$0 sm:$0xff] }
   0x7   :  { %464 = vmatpush.bf16.msra.mxu2 %v458_v1  ;;  %465 = vmatpush.bf16.msra.mxu3 %v458_v1  ;;  %v40_v21 = vld [vmem:[%s860_s0 + $0x78] sm:$0xff]  ;;  %v46_v24 = vpack.c.bf16 %v36_v19, %v35_v18  ;;  %v635_v16 = vld [vmem:[%s862_s3] ss:$0 sm:$0xff] }
   0x8   :  { %v48_v25 = vpack.c.bf16 %v40_v21, %v39_v20 }
   0x9   :  { %450 = vmatmul.msk.bf16.vlgmr.msra.gmra.mxu0 %vm69_vm0, %v41_v10  ;;  %452 = vmatmul.msk.bf16.vlgmr.msra.gmra.mxu1 %vm69_vm0, %v43_v11 }
   0xa   :  { %454 = vmatmul.msk.bf16.vlgmr.msra.gmra.mxu2 %vm69_vm0, %v45_v12  ;;  %456 = vmatmul.msk.bf16.vlgmr.msra.gmra.mxu3 %vm69_vm0, %v47_v13 }
  0x19   :  { %451 = vmatmul.msk.bf16.gmra.mxu0 %vm69_vm0, %v42_v22  ;;  %453 = vmatmul.msk.bf16.gmra.mxu1 %vm69_vm0, %v44_v23 }
  0x1a   :  { %455 = vmatmul.msk.bf16.gmra.mxu2 %vm69_vm0, %v46_v24  ;;  %457 = vmatmul.msk.bf16.gmra.mxu3 %vm69_vm0, %v48_v25 }
  0x86   :  { %v103_v27 = vpop.f32.mrf.mxu0  ;;  %v113_v28 = vpop.f32.mrf.mxu1 }
  0x87   :  { %v104_v29 = vadd.f32 %v600_v26, %v103_v27  ;;  %v114_v30 = vadd.f32 %v600_v26, %v113_v28 }
  0x89   :  { %v163_v31 = vmul.f32 0.044715, %v114_v30  ;;  %v159_v32 = vmul.f32 0.044715, %v104_v29  ;;  %v147_v9 = vmul.f32 0.5, %v114_v30  ;;  %v143_v17 = vmul.f32 0.5, %v104_v29 }
  0x8b   :  { %v179_v33 = vmul.f32 %v163_v31, %v114_v30  ;;  %v175_v34 = vmul.f32 %v159_v32, %v104_v29 }
  0x8d   :  { %v123_v35 = vpop.f32.mrf.mxu2  ;;  %v133_v36 = vpop.f32.mrf.mxu3  ;;  %v195_v37 = vmul.f32 %v179_v33, %v114_v30  ;;  %v191_v38 = vmul.f32 %v175_v34, %v104_v29 }
  0x8e   :  { %v124_v39 = vadd.f32 %v600_v26, %v123_v35  ;;  %v134_v40 = vadd.f32 %v600_v26, %v133_v36  ;;  %v105_v41 = vpop.f32.mrf.mxu0  ;;  %v115_v42 = vpop.f32.mrf.mxu1 }
  0x8f   :  { %v607_v43 = vadd.f32 %v600_v26, %v105_v41  ;;  %v610_v44 = vadd.f32 %v600_v26, %v115_v42  ;;  %v211_v45 = vadd.f32 %v195_v37, %v114_v30  ;;  %v207_v46 = vadd.f32 %v191_v38, %v104_v29 }
  0x90   :  { %v167_v47 = vmul.f32 0.044715, %v124_v39  ;;  %v171_v48 = vmul.f32 0.044715, %v134_v40  ;;  %v151_v30 = vmul.f32 0.5, %v124_v39  ;;  %v155_v33 = vmul.f32 0.5, %v134_v40 }
  0x91   :  { %v160_v49 = vmul.f32 0.044715, %v607_v43  ;;  %v164_v50 = vmul.f32 0.044715, %v610_v44  ;;  %v227_v51 = vmul.f32 0.7978846, %v211_v45 }
  0x92   :  { %v223_v52 = vmul.f32 0.7978846, %v207_v46  ;;  %v183_v53 = vmul.f32 %v167_v47, %v124_v39  ;;  %v187_v54 = vmul.f32 %v171_v48, %v134_v40  ;;  %v148_v38 = vmul.f32 0.5, %v610_v44 }
  0x93   :  { %468 = vtanh.f32 %v227_v51  ;;  %v180_v55 = vmul.f32 %v164_v50, %v610_v44  ;;  %v176_v56 = vmul.f32 %v160_v49, %v607_v43 }
  0x94   :  { %470 = vtanh.f32 %v223_v52  ;;  %v199_v57 = vmul.f32 %v183_v53, %v124_v39  ;;  %v203_v58 = vmul.f32 %v187_v54, %v134_v40 }
  0x95   :  { %v125_v59 = vpop.f32.mrf.mxu2  ;;  %v616_v60 = vpop.f32.mrf.mxu3  ;;  %v196_v61 = vmul.f32 %v180_v55, %v610_v44  ;;  %v192_v62 = vmul.f32 %v176_v56, %v607_v43 }
  0x96   :  { %v621_v63 = vadd.f32 %v600_v26, %v125_v59  ;;  %v108_v0 = vpop.f32.mrf.mxu0  ;;  %v118_v1 = vpop.f32.mrf.mxu1  ;;  %v215_v2 = vadd.f32 %v199_v57, %v124_v39  ;;  %v219_v3 = vadd.f32 %v203_v58, %v134_v40  ;;  %v144_v40 = vmul.f32 0.5, %v607_v43 }
  0x97   :  { %v624_v4 = vadd.f32 %v600_v26, %v108_v0  ;;  %v627_v5 = vadd.f32 %v600_v26, %v118_v1  ;;  %v212_v6 = vadd.f32 %v196_v61, %v610_v44  ;;  %v208_v7 = vadd.f32 %v192_v62, %v607_v43 }
  0x98   :  { %v168_v8 = vmul.f32 0.044715, %v621_v63  ;;  %v231_v10 = vmul.f32 0.7978846, %v215_v2  ;;  %v235_v12 = vmul.f32 0.7978846, %v219_v3  ;;  %v669_v1 = vadd.f32 %v600_v26, %v616_v60 }
  0x99   :  { %v469_v11 = vpop.eup %468  ;;  %v228_v13 = vmul.f32 0.7978846, %v212_v6  ;;  %v161_v18 = vmul.f32 0.044715, %v624_v4  ;;  %v165_v19 = vmul.f32 0.044715, %v627_v5 }
  0x9a   :  { %v471_v14 = vpop.eup %470  ;;  %v259_v15 = vadd.f32 1.0, %v469_v11  ;;  %472 = vtanh.f32 %v231_v10  ;;  %v224_v21 = vmul.f32 0.7978846, %v208_v7  ;;  %v184_v24 = vmul.f32 %v168_v8, %v621_v63 }
  0x9b   :  { %v255_v20 = vadd.f32 1.0, %v471_v14  ;;  %474 = vtanh.f32 %v235_v12  ;;  %v177_v23 = vmul.f32 %v161_v18, %v624_v4  ;;  %v181_v46 = vmul.f32 %v165_v19, %v627_v5 }
  0x9c   :  { %v275_v22 = vmul.f32 %v259_v15, %v147_v9  ;;  %476 = vtanh.f32 %v228_v13  ;;  %v200_v39 = vmul.f32 %v184_v24, %v621_v63 }
  0x9d   :  { %v128_v25 = vpop.f32.mrf.mxu2  ;;  %v138_v27 = vpop.f32.mrf.mxu3  ;;  %v271_v28 = vmul.f32 %v255_v20, %v143_v17  ;;  %478 = vtanh.f32 %v224_v21  ;;  %v193_v34 = vmul.f32 %v177_v23, %v624_v4  ;;  %v197_v14 = vmul.f32 %v181_v46, %v627_v5 }
  0x9e   :  { %v642_v29 = vadd.f32 %v600_v26, %v128_v25  ;;  %v110_v31 = vpop.f32.mrf.mxu0  ;;  %v295_v32 = vmul.f32 %v635_v16, %v275_v22  ;;  %v120_v36 = vpop.f32.mrf.mxu1  ;;  %v657_v48 = vadd.f32 %v600_v26, %v138_v27  ;;  %v216_v50 = vadd.f32 %v200_v39, %v621_v63 }
  0x9f   :  { %v647_v35 = vadd.f32 %v600_v26, %v110_v31  ;;  %v291_v37 = vmul.f32 %v635_v16, %v271_v28  ;;  %v209_v45 = vadd.f32 %v193_v34, %v624_v4  ;;  %v662_v52 = vadd.f32 %v600_v26, %v120_v36 }
  0xa0   :  { %v473_v41 = vpop.eup %472  ;;  %v169_v42 = vmul.f32 0.044715, %v642_v29  ;;  %315 = vadd.xlane.f32.xlu2 %v295_v32  ;;  %v232_v58 = vmul.f32 0.7978846, %v216_v50  ;;  %v173_v2 = vmul.f32 0.044715, %v657_v48  ;;  %v213_v21 = vadd.f32 %v197_v14, %v627_v5 }
  0xa1   :  { %v475_v47 = vpop.eup %474  ;;  %v162_v49 = vmul.f32 0.044715, %v647_v35  ;;  %307 = vadd.xlane.f32.xlu0 %v291_v37  ;;  %v263_v44 = vadd.f32 1.0, %v473_v41  ;;  %v225_v54 = vmul.f32 0.7978846, %v209_v45 }
  0xa2   :  { %v477_v51 = vpop.eup %476  ;;  %v267_v53 = vadd.f32 1.0, %v475_v47  ;;  %v185_v43 = vmul.f32 %v169_v42, %v642_v29  ;;  %v166_v8 = vmul.f32 0.044715, %v662_v52  ;;  %v172_v23 = vmul.f32 0.044715, %v669_v1 }
  0xa3   :  { %v479_v55 = vpop.eup %478  ;;  %v279_v56 = vmul.f32 %v263_v44, %v151_v30  ;;  %v260_v57 = vadd.f32 1.0, %v477_v51  ;;  %v178_v59 = vmul.f32 %v162_v49, %v647_v35  ;;  %480 = vtanh.f32 %v225_v54 }
  0xa4   :  { %v283_v61 = vmul.f32 %v267_v53, %v155_v33  ;;  %v256_v62 = vadd.f32 1.0, %v479_v55  ;;  %v201_v0 = vmul.f32 %v185_v43, %v642_v29  ;;  %482 = vtanh.f32 %v232_v58 }
  0xa5   :  { %v130_v3 = vpop.f32.mrf.mxu2  ;;  %v140_v6 = vpop.f32.mrf.mxu3  ;;  %v194_v7 = vmul.f32 %v178_v59, %v647_v35  ;;  %v299_v11 = vmul.f32 %v635_v16, %v279_v56  ;;  %v276_v17 = vmul.f32 %v260_v57, %v148_v38  ;;  %v189_v25 = vmul.f32 %v173_v2, %v657_v48 }
  0xa6   :  { %v675_v9 = vadd.f32 %v600_v26, %v130_v3  ;;  %v678_v10 = vadd.f32 %v600_v26, %v140_v6  ;;  %v303_v60 = vmul.f32 %v635_v16, %v283_v61  ;;  %v217_v12 = vadd.f32 %v201_v0, %v642_v29 }
  0xa7   :  { %v210_v13 = vadd.f32 %v194_v7, %v647_v35  ;;  %v272_v18 = vmul.f32 %v256_v62, %v144_v40  ;;  %v182_v27 = vmul.f32 %v166_v8, %v662_v52  ;;  %v145_v30 = vmul.f32 0.5, %v624_v4 }
  0xa8   :  { %v170_v15 = vmul.f32 0.044715, %v675_v9  ;;  %323 = vadd.xlane.f32.xlu2 %v299_v11  ;;  %v174_v19 = vmul.f32 0.044715, %v678_v10  ;;  %v233_v26 = vmul.f32 0.7978846, %v217_v12  ;;  %v296_v33 = vmul.f32 %v635_v16, %v276_v17 }
  0xa9   :  { %331 = vadd.xlane.f32.xlu0 %v303_v60  ;;  %v226_v20 = vmul.f32 0.7978846, %v210_v13  ;;  %v481_v22 = vpop.eup %480  ;;  %v229_v32 = vmul.f32 0.7978846, %v213_v21  ;;  %v292_v34 = vmul.f32 %v635_v16, %v272_v18  ;;  %v205_v37 = vmul.f32 %v189_v25, %v657_v48 }
  0xaa   :  { %v186_v24 = vmul.f32 %v170_v15, %v675_v9  ;;  %v483_v28 = vpop.eup %482  ;;  %v257_v31 = vadd.f32 1.0, %v481_v22  ;;  %484 = vtanh.f32 %v233_v26  ;;  %v198_v39 = vmul.f32 %v182_v27, %v662_v52 }
  0xab   :  { %486 = vtanh.f32 %v226_v20  ;;  %v190_v41 = vmul.f32 %v174_v19, %v678_v10  ;;  %v264_v42 = vadd.f32 1.0, %v483_v28  ;;  %v221_v45 = vadd.f32 %v205_v37, %v657_v48 }
  0xac   :  { %v202_v36 = vmul.f32 %v186_v24, %v675_v9  ;;  %v273_v38 = vmul.f32 %v257_v31, %v145_v30  ;;  %488 = vtanh.f32 %v229_v32  ;;  %v214_v46 = vadd.f32 %v198_v39, %v662_v52 }
  0xad   :  { %v206_v47 = vmul.f32 %v190_v41, %v678_v10  ;;  %v188_v49 = vmul.f32 %v172_v23, %v669_v1  ;;  %v237_v50 = vmul.f32 0.7978846, %v221_v45  ;;  %v152_v53 = vmul.f32 0.5, %v621_v63 }
  0xae   :  { %v218_v4 = vadd.f32 %v202_v36, %v675_v9  ;;  %v293_v40 = vmul.f32 %v635_v16, %v273_v38  ;;  %v230_v54 = vmul.f32 0.7978846, %v214_v46  ;;  %v153_v55 = vmul.f32 0.5, %v642_v29  ;;  %v361_v38 = vld [vmem:[%s864_s4 + $0x20] sm:$0xff] }
  0xaf   :  { %v222_v43 = vadd.f32 %v206_v47, %v678_v10  ;;  %v204_v57 = vmul.f32 %v188_v49, %v669_v1  ;;  %v280_v59 = vmul.f32 %v264_v42, %v152_v53  ;;  %v149_v2 = vmul.f32 0.5, %v627_v5  ;;  %v365_v47 = vld [vmem:[%s864_s4 + $0x40] sm:$0xff] }
  0xb0   :  { %317 = vadd.xlane.f32.xlu2 %v296_v33  ;;  %v234_v44 = vmul.f32 0.7978846, %v218_v4  ;;  %v485_v51 = vpop.eup %484  ;;  %311 = vadd.xlane.f32.xlu1 %v293_v40  ;;  %v154_v11 = vmul.f32 0.5, %v675_v9  ;;  %v146_v12 = vmul.f32 0.5, %v647_v35  ;;  %v157_v20 = vmul.f32 0.5, %v657_v48 }
  0xb1   :  { %309 = vadd.xlane.f32.xlu0 %v292_v34  ;;  %v265_v56 = vadd.f32 1.0, %v485_v51  ;;  %v487_v58 = vpop.eup %486  ;;  %v238_v61 = vmul.f32 0.7978846, %v222_v43  ;;  %v220_v63 = vadd.f32 %v204_v57, %v669_v1  ;;  %v300_v29 = vmul.f32 %v635_v16, %v280_v59  ;;  %v362_v57 = vld [vmem:[%s864_s4 + $0x28] sm:$0xff] }
  0xb2   :  { %490 = vtanh.f32 %v234_v44  ;;  %v489_v62 = vpop.eup %488  ;;  %v258_v6 = vadd.f32 1.0, %v487_v58  ;;  %v150_v25 = vmul.f32 0.5, %v662_v52  ;;  %v158_v27 = vmul.f32 0.5, %v678_v10 }
  0xb3   :  { %v281_v0 = vmul.f32 %v265_v56, %v153_v55  ;;  %492 = vtanh.f32 %v237_v50  ;;  %v261_v7 = vadd.f32 1.0, %v489_v62  ;;  %v236_v14 = vmul.f32 0.7978846, %v220_v63  ;;  %v369_v50 = vld [vmem:[%s864_s4 + $0x60] sm:$0xff] }
  0xb4   :  { %494 = vtanh.f32 %v230_v54  ;;  %v274_v17 = vmul.f32 %v258_v6, %v146_v12  ;;  %v156_v36 = vmul.f32 0.5, %v669_v1  ;;  %v729_v10 = vstv %s863_s5  ;;  %v357_v1 = vld [vmem:[%s864_s4] sm:$0xff]  ;;  %v367_v12 = vld [vmem:[%s864_s4 + $0x50] sm:$0xff] }
  0xb5   :  { %496 = vtanh.f32 %v238_v61  ;;  %v301_v3 = vmul.f32 %v635_v16, %v281_v0  ;;  %v277_v18 = vmul.f32 %v261_v7, %v149_v2  ;;  %v359_v61 = vld [vmem:[%s864_s4 + $0x10] sm:$0xff]  ;;  %v358_v0 = vld [vmem:[%s864_s4 + $0x8] sm:$0xff] }
  0xb6   :  { %498 = vtanh.f32 %v236_v14  ;;  %v294_v22 = vmul.f32 %v635_v16, %v274_v17  ;;  %v366_v14 = vld [vmem:[%s864_s4 + $0x48] sm:$0xff] }
  0xb7   :  { %v297_v9 = vmul.f32 %v635_v16, %v277_v18 }
  0xb8   :  { %v491_v8 = vpop.eup %490  ;;  %327 = vadd.xlane.f32.xlu1 %v301_v3 }
  0xb9   :  { %325 = vadd.xlane.f32.xlu0 %v300_v29  ;;  %v266_v60 = vadd.f32 1.0, %v491_v8  ;;  %v493_v13 = vpop.eup %492 }
  0xba   :  { %v495_v5 = vpop.eup %494  ;;  %v269_v21 = vadd.f32 1.0, %v493_v13 }
  0xbb   :  { %v282_v15 = vmul.f32 %v266_v60, %v154_v11  ;;  %v497_v19 = vpop.eup %496  ;;  %v262_v23 = vadd.f32 1.0, %v495_v5 }
  0xbc   :  { %v270_v35 = vadd.f32 1.0, %v497_v19  ;;  %v285_v24 = vmul.f32 %v269_v21, %v157_v20  ;;  %v499_v31 = vpop.eup %498  ;;  %v368_v21 = vld [vmem:[%s864_s4 + $0x58] sm:$0xff] }
  0xbd   :  { %v302_v26 = vmul.f32 %v635_v16, %v282_v15  ;;  %v278_v28 = vmul.f32 %v262_v23, %v150_v25  ;;  %v268_v34 = vadd.f32 1.0, %v499_v31  ;;  %v360_v23 = vld [vmem:[%s864_s4 + $0x18] sm:$0xff] }
  0xbe   :  { %v286_v30 = vmul.f32 %v270_v35, %v158_v27  ;;  %v305_v48 = vmul.f32 %v635_v16, %v285_v24  ;;  %v363_v24 = vld [vmem:[%s864_s4 + $0x30] sm:$0xff] }
  0xbf   :  { %329 = vadd.xlane.f32.xlu2 %v302_v26  ;;  %v298_v32 = vmul.f32 %v635_v16, %v278_v28  ;;  %v284_v37 = vmul.f32 %v268_v34, %v156_v36  ;;  %v371_v36 = vld [vmem:[%s864_s4 + $0x70] sm:$0xff] }
  0xc0   :  { %313 = vadd.xlane.f32.xlu1 %v294_v22  ;;  %v306_v33 = vmul.f32 %v635_v16, %v286_v30 }
  0xc1   :  { %319 = vadd.xlane.f32.xlu0 %v297_v9  ;;  %v304_v52 = vmul.f32 %v635_v16, %v284_v37 }
  0xc7   :  { %335 = vadd.xlane.f32.xlu2 %v305_v48 }
  0xc8   :  { %321 = vadd.xlane.f32.xlu1 %v298_v32 }
  0xc9   :  { %337 = vadd.xlane.f32.xlu0 %v306_v33 }
  0xd0   :  { %333 = vadd.xlane.f32.xlu1 %v304_v52 }
 0x113   :  { %v316_v39 = vpop.xlane.xlu2 %315 }
 0x114   :  { %v345_v41 = vadd.f32 %v729_v10, %v316_v39  ;;  %v308_v42 = vpop.xlane.xlu0 %307 }
 0x115   :  { %v341_v16 = vadd.f32 %v729_v10, %v308_v42 }
 0x116   :  { %v377_v4 = vmul.f32 %v361_v38, %v345_v41  ;;  %v364_v38 = vld [vmem:[%s864_s4 + $0x38] sm:$0xff] }
 0x117   :  { %v373_v45 = vmul.f32 %v357_v1, %v341_v16  ;;  %v372_v41 = vld [vmem:[%s864_s4 + $0x78] sm:$0xff] }
 0x118   :  { %vm393_vm2 = vcmp.eq.f32.partialorder %v377_v4, 0.0 }
 0x119   :  { %v409_v40 = vsel %vm393_vm2, -9000.0, %v377_v4  ;;  %vm389_vm3 = vcmp.eq.f32.partialorder %v373_v45, 0.0 }
 0x11a   :  { %426 = vst.msk [vmem:[%s865_s6 + $0x20] sm:$0xff] %vm421_vm1, %v409_v40  ;;  %v405_v46 = vsel %vm389_vm3, -9000.0, %v373_v45 }
 0x11b   :  { %422 = vst.msk [vmem:[%s865_s6] sm:$0xff] %vm421_vm1, %v405_v46  ;;  %v324_v49 = vpop.xlane.xlu2 %323 }
 0x11c   :  { %v349_v44 = vadd.f32 %v729_v10, %v324_v49  ;;  %v332_v51 = vpop.xlane.xlu0 %331 }
 0x11d   :  { %v353_v53 = vadd.f32 %v729_v10, %v332_v51 }
 0x11e   :  { %v381_v54 = vmul.f32 %v365_v47, %v349_v44  ;;  %v370_v44 = vld [vmem:[%s864_s4 + $0x68] sm:$0xff] }
 0x11f   :  { %v385_v43 = vmul.f32 %v369_v50, %v353_v53 }
 0x120   :  { %vm397_vm4 = vcmp.eq.f32.partialorder %v381_v54, 0.0 }
 0x121   :  { %v413_v55 = vsel %vm397_vm4, -9000.0, %v381_v54  ;;  %vm401_vm5 = vcmp.eq.f32.partialorder %v385_v43, 0.0 }
 0x122   :  { %430 = vst.msk [vmem:[%s865_s6 + $0x40] sm:$0xff] %vm421_vm1, %v413_v55  ;;  %v417_v56 = vsel %vm401_vm5, -9000.0, %v385_v43 }
 0x123   :  { %434 = vst.msk [vmem:[%s865_s6 + $0x60] sm:$0xff] %vm421_vm1, %v417_v56  ;;  %v318_v58 = vpop.xlane.xlu2 %317  ;;  %v312_v62 = vpop.xlane.xlu1 %311 }
 0x124   :  { %v346_v59 = vadd.f32 %v729_v10, %v318_v58  ;;  %v310_v2 = vpop.xlane.xlu0 %309  ;;  %v343_v63 = vadd.f32 %v729_v10, %v312_v62 }
 0x125   :  { %v342_v3 = vadd.f32 %v729_v10, %v310_v2 }
 0x126   :  { %v378_v29 = vmul.f32 %v362_v57, %v346_v59  ;;  %v375_v6 = vmul.f32 %v359_v61, %v343_v63 }
 0x127   :  { %v374_v7 = vmul.f32 %v358_v0, %v342_v3 }
 0x128   :  { %vm394_vm6 = vcmp.eq.f32.partialorder %v378_v29, 0.0  ;;  %vm391_vm7 = vcmp.eq.f32.partialorder %v375_v6, 0.0 }
 0x129   :  { %v410_v8 = vsel %vm394_vm6, -9000.0, %v378_v29  ;;  %vm390_vm8 = vcmp.eq.f32.partialorder %v374_v7, 0.0  ;;  %v407_v11 = vsel %vm391_vm7, -9000.0, %v375_v6 }
 0x12a   :  { %427 = vst.msk [vmem:[%s865_s6 + $0x28] sm:$0xff] %vm421_vm1, %v410_v8  ;;  %v406_v60 = vsel %vm390_vm8, -9000.0, %v374_v7 }
 0x12b   :  { %424 = vst.msk [vmem:[%s865_s6 + $0x10] sm:$0xff] %vm421_vm1, %v407_v11  ;;  %v328_v13 = vpop.xlane.xlu1 %327 }
 0x12c   :  { %423 = vst.msk [vmem:[%s865_s6 + $0x8] sm:$0xff] %vm421_vm1, %v406_v60  ;;  %v326_v5 = vpop.xlane.xlu0 %325  ;;  %v351_v15 = vadd.f32 %v729_v10, %v328_v13 }
 0x12d   :  { %v350_v17 = vadd.f32 %v729_v10, %v326_v5 }
 0x12e   :  { %v383_v18 = vmul.f32 %v367_v12, %v351_v15 }
 0x12f   :  { %v382_v19 = vmul.f32 %v366_v14, %v350_v17 }
 0x130   :  { %vm399_vm9 = vcmp.eq.f32.partialorder %v383_v18, 0.0 }
 0x131   :  { %vm398_vm10 = vcmp.eq.f32.partialorder %v382_v19, 0.0  ;;  %v415_v26 = vsel %vm399_vm9, -9000.0, %v383_v18 }
 0x132   :  { %v414_v20 = vsel %vm398_vm10, -9000.0, %v382_v19  ;;  %v330_v22 = vpop.xlane.xlu2 %329  ;;  %432 = vst.msk [vmem:[%s865_s6 + $0x50] sm:$0xff] %vm421_vm1, %v415_v26 }
 0x133   :  { %v352_v9 = vadd.f32 %v729_v10, %v330_v22  ;;  %431 = vst.msk [vmem:[%s865_s6 + $0x48] sm:$0xff] %vm421_vm1, %v414_v20  ;;  %v314_v35 = vpop.xlane.xlu1 %313 }
 0x134   :  { %v320_v25 = vpop.xlane.xlu0 %319  ;;  %v344_v28 = vadd.f32 %v729_v10, %v314_v35 }
 0x135   :  { %v384_v27 = vmul.f32 %v368_v21, %v352_v9  ;;  %v347_v30 = vadd.f32 %v729_v10, %v320_v25 }
 0x136   :  { %v376_v31 = vmul.f32 %v360_v23, %v344_v28 }
 0x137   :  { %vm400_vm11 = vcmp.eq.f32.partialorder %v384_v27, 0.0  ;;  %v379_v48 = vmul.f32 %v363_v24, %v347_v30 }
 0x138   :  { %v416_v32 = vsel %vm400_vm11, -9000.0, %v384_v27  ;;  %vm392_vm12 = vcmp.eq.f32.partialorder %v376_v31, 0.0 }
 0x139   :  { %433 = vst.msk [vmem:[%s865_s6 + $0x58] sm:$0xff] %vm421_vm1, %v416_v32  ;;  %vm395_vm13 = vcmp.eq.f32.partialorder %v379_v48, 0.0  ;;  %v408_v33 = vsel %vm392_vm12, -9000.0, %v376_v31 }
 0x13a   :  { %v411_v34 = vsel %vm395_vm13, -9000.0, %v379_v48  ;;  %v336_v37 = vpop.xlane.xlu2 %335  ;;  %425 = vst.msk [vmem:[%s865_s6 + $0x18] sm:$0xff] %vm421_vm1, %v408_v33 }
 0x13b   :  { %v355_v52 = vadd.f32 %v729_v10, %v336_v37  ;;  %428 = vst.msk [vmem:[%s865_s6 + $0x30] sm:$0xff] %vm421_vm1, %v411_v34  ;;  %v322_v39 = vpop.xlane.xlu1 %321 }
 0x13c   :  { %v338_v1 = vpop.xlane.xlu0 %337  ;;  %v348_v16 = vadd.f32 %v729_v10, %v322_v39 }
 0x13d   :  { %v387_v42 = vmul.f32 %v371_v36, %v355_v52  ;;  %v356_v4 = vadd.f32 %v729_v10, %v338_v1 }
 0x13e   :  { %v380_v45 = vmul.f32 %v364_v38, %v348_v16 }
 0x13f   :  { %vm403_vm14 = vcmp.eq.f32.partialorder %v387_v42, 0.0  ;;  %v388_v40 = vmul.f32 %v372_v41, %v356_v4 }
 0x140   :  { %v419_v46 = vsel %vm403_vm14, -9000.0, %v387_v42  ;;  %vm396_vm15 = vcmp.eq.f32.partialorder %v380_v45, 0.0 }
 0x141   :  { %436 = vst.msk [vmem:[%s865_s6 + $0x70] sm:$0xff] %vm421_vm1, %v419_v46  ;;  %vm404_vm0 = vcmp.eq.f32.partialorder %v388_v40, 0.0  ;;  %v412_v47 = vsel %vm396_vm15, -9000.0, %v380_v45 }
 0x142   :  { %v420_v49 = vsel %vm404_vm0, -9000.0, %v388_v40  ;;  %429 = vst.msk [vmem:[%s865_s6 + $0x38] sm:$0xff] %vm421_vm1, %v412_v47 }
 0x143   :  { %437 = vst.msk [vmem:[%s865_s6 + $0x78] sm:$0xff] %vm421_vm1, %v420_v49  ;;  %v334_v50 = vpop.xlane.xlu1 %333 }
 0x144   :  { %v354_v51 = vadd.f32 %v729_v10, %v334_v50 }
 0x146   :  { %v386_v53 = vmul.f32 %v370_v44, %v354_v51 }
 0x148   :  { %vm402_vm2 = vcmp.eq.f32.partialorder %v386_v53, 0.0 }
 0x149   :  { %v418_v54 = vsel %vm402_vm2, -9000.0, %v386_v53 }
 0x14a   :  { %435 = vst.msk [vmem:[%s865_s6 + $0x68] sm:$0xff] %vm421_vm1, %v418_v54 }

</bundles_post_ra>
